<compile_context>
chip_gen: v6e
topology: v6e:2x2x1
jax: 0.10.0
libtpu: 0.0.40
codegen_flags: <defaults>
</compile_context>

<pallas_src>
import functools

import numpy as np
import jax
import jax.numpy as jnp
from jax import lax
from jax.experimental import pallas as pl
from jax.experimental.pallas import tpu as pltpu

_LANE = 128
_CHUNK_ROWS = 512  # rows per in-kernel compute chunk (bounds live vregs)


def _round_up(x, m):
    return ((x + m - 1) // m) * m


def _cdiv(a, b):
    return (a + b - 1) // b


def _vmem_capacity_bytes():
    """Physical VMEM of the current generation; conservative fallback (v7x)."""
    try:
        info = pltpu.get_tpu_info()
        cap = getattr(info, "vmem_capacity_bytes", None)
        if cap:
            return int(cap)
    except Exception:
        pass
    return 64 << 20


def _gaussian_smearing_kernel(dist_ref, out_ref, *, coeff, start, step,
                              resolution, chunk):
    # dist_ref : (TN, 1) tile of flattened distances
    # out_ref  : (TN, R) smeared output tile
    tile = dist_ref.shape[0]

    # Offset row built in-kernel: start + i * step, i = 0..R-1  -> (1, R).
    off = (lax.broadcasted_iota(jnp.int32, (1, resolution), 1)
           .astype(jnp.float32) * step + start)

    def smear(row0, rows):
        d = dist_ref[pl.ds(row0, rows), :]            # (rows, 1)
        diff = d - off                                # (rows, R)
        out_ref[pl.ds(row0, rows), :] = (
            jnp.exp(coeff * (diff * diff)).astype(out_ref.dtype))

    n_full = tile // chunk
    rem = tile - n_full * chunk

    if n_full > 0:
        def body(c, carry):
            smear(pl.multiple_of(c * chunk, chunk), chunk)
            return carry
        lax.fori_loop(0, n_full, body, 0)
    if rem:
        smear(n_full * chunk, rem)


def gaussian_smearing(dist, start=0.0, stop=5.0, resolution=50, width=0.05,
                      tile_n=None, out_dtype=jnp.float32):
    """Pallas TPU implementation of GaussianSmearing.forward.

    dist: float array of any shape (...,). Returns (..., resolution).
    tile_n: optional row-tile override (auto-sized from VMEM if None).
    out_dtype: jnp.float32 (default, matches PyTorch) or jnp.bfloat16.
    """
    dist = jnp.asarray(dist, jnp.float32)
    orig_shape = dist.shape
    n = int(dist.size)
    coeff = float(-0.5 / ((stop - start) * width) ** 2)
    step = float((stop - start) / (resolution - 1)) if resolution > 1 else 0.0

    # Empty input: nothing to compute.
    if n == 0:
        return jnp.zeros((*orig_shape, resolution), out_dtype)

    out_itemsize = np.dtype(out_dtype).itemsize
    row_mult = 16 if out_itemsize == 2 else 8      # sublane packing granularity

    # ---- per-generation tile sizing (HBM-write bound kernel) -------------
    # Double-buffered VMEM cost per row of a tile (both blocks lane-padded):
    in_row = 2 * _LANE * 4                                   # (TN,1) f32 block
    out_row = 2 * _round_up(resolution, _LANE) * out_itemsize  # (TN,R) block
    per_row = in_row + out_row                               # ~2 KiB/row (f32)

    vmem_cap = _vmem_capacity_bytes()
    vmem_budget = min(vmem_cap // 3, 32 << 20)               # leave ample headroom
    auto_rows = max(512, (vmem_budget // per_row) // row_mult * row_mult)

    n_al = _round_up(n, row_mult)
    eff_tile = min(tile_n if tile_n is not None else auto_rows, auto_rows)
    eff_tile = max(row_mult, (eff_tile // row_mult) * row_mult)

    if n_al <= eff_tile:
        if n_al >= 4096:
            # Split so v7x's two TensorCores both get work; on 1-TC chips the
            # extra ~0.35us step is negligible at this size.
            eff_tile = _round_up(_cdiv(n_al, 2), row_mult)
        else:
            eff_tile = n_al   # single grid step for small, latency-bound calls

    grid_n = _cdiv(n_al, eff_tile)
    # Rebalance tiles so row padding (and the wrapper-side slice) stays small.
    eff_tile = _round_up(_cdiv(n_al, grid_n), row_mult)
    n_padded = grid_n * eff_tile

    dist_flat = dist.reshape(-1, 1)
    pad = n_padded - n
    if pad:
        dist_flat = jnp.pad(dist_flat, ((0, pad), (0, 0)))

    chunk = min(_CHUNK_ROWS, eff_tile)

    kernel = functools.partial(
        _gaussian_smearing_kernel,
        coeff=coeff, start=float(start), step=step,
        resolution=resolution, chunk=chunk)

    # Explicit VMEM budget: actual tile footprint + headroom for compiler
    # scratch / spills, capped well below physical capacity.
    tile_vmem = eff_tile * per_row
    vmem_limit = int(min(tile_vmem + (8 << 20), vmem_cap * 3 // 4))
    vmem_limit = max(vmem_limit, 16 << 20)

    out = pl.pallas_call(
        kernel,
        out_shape=jax.ShapeDtypeStruct((n_padded, resolution), out_dtype),
        grid_spec=pltpu.PrefetchScalarGridSpec(
            num_scalar_prefetch=0,
            grid=(grid_n,),
            in_specs=[
                # (eff_tile, 1) tile of distances; last dim == full array dim.
                pl.BlockSpec((eff_tile, 1), lambda i: (i, 0)),
            ],
            out_specs=pl.BlockSpec((eff_tile, resolution), lambda i: (i, 0)),
        ),
        compiler_params=pltpu.CompilerParams(
            dimension_semantics=("parallel",),
            vmem_limit_bytes=vmem_limit),
    )(dist_flat)

    if pad:
        out = out[:n]
    return out.reshape(*orig_shape, resolution)


def _reference(dist, start=0.0, stop=5.0, resolution=50, width=0.05):
    offset = jnp.linspace(start, stop, resolution, dtype=jnp.float32)
    coeff = -0.5 / ((stop - start) * width) ** 2
    d = dist[..., None] - offset.reshape(1, -1)
    return jnp.exp(coeff * d * d)


if __name__ == "__main__":
    key = jax.random.PRNGKey(0)
    k1, k2, k3 = jax.random.split(key, 3)

    # 1D case: small batch of edge distances, shape (64,).
    d1 = jax.random.uniform(k1, (64,), dtype=jnp.float32, minval=0.0, maxval=5.0)
    o1 = jax.block_until_ready(gaussian_smearing(d1))
    r1 = _reference(d1)
    assert o1.shape == (64, 50), o1.shape
    assert jnp.allclose(o1, r1, atol=1e-5, rtol=1e-5), "mismatch (1D)"

    # 2D case with a row count that is not a multiple of 8 (padding path).
    d2 = jax.random.uniform(k2, (3, 7), dtype=jnp.float32, minval=0.0, maxval=5.0)
    o2 = jax.block_until_ready(gaussian_smearing(d2))
    r2 = _reference(d2)
    assert o2.shape == (3, 7, 50), o2.shape
    assert jnp.allclose(o2, r2, atol=1e-5, rtol=1e-5), "mismatch (2D)"

    # Moderately larger case: exercises the 2-step grid split, the chunked
    # in-kernel fori_loop and the tail chunk.
    d3 = jax.random.uniform(k3, (8, 600), dtype=jnp.float32, minval=0.0, maxval=5.0)
    o3 = jax.block_until_ready(gaussian_smearing(d3))
    r3 = _reference(d3)
    assert o3.shape == (8, 600, 50), o3.shape
    assert jnp.allclose(o3, r3, atol=1e-5, rtol=1e-5), "mismatch (chunked)"

    print("KERNEL_OK")
</pallas_src>

<mosaic_0001>
module attributes {stable_mosaic.version = 11 : i64} {
  func.func @_gaussian_smearing_kernel(%arg0: i32, %arg1: memref<64x1xf32, #tpu.memory_space<vmem>>, %arg2: memref<64x50xf32, #tpu.memory_space<vmem>>) attributes {dimension_semantics = [#tpu.dimension_semantics<parallel>], iteration_bounds = array<i64: 1>, scalar_prefetch = 0 : i64, scratch_operands = 0 : i64, tpu.core_type = #tpu.core_type<tc>, window_params = [{transform_indices = @transform_0, window_bounds = array<i64: 64, 1>}, {transform_indices = @transform_1, window_bounds = array<i64: 64, 50>}]} {
    %0 = tpu.iota {dimensions = array<i32: 1>} : vector<1x50xi32>
    %1 = arith.sitofp %0 : vector<1x50xi32> to vector<1x50xf32>
    %cst = arith.constant 0.10204082 : f32
    %2 = vector.broadcast %cst : f32 to vector<1x50xf32>
    %3 = arith.mulf %1, %2 : vector<1x50xf32>
    %cst_0 = arith.constant 0.000000e+00 : f32
    %4 = vector.broadcast %cst_0 : f32 to vector<1x50xf32>
    %5 = arith.addf %3, %4 : vector<1x50xf32>
    %c0_i32 = arith.constant 0 : i32
    %c64_i32 = arith.constant 64 : i32
    %6 = arith.muli %c0_i32, %c64_i32 : i32
    %7 = tpu.assume_multiple %6, 64 : i32
    %8 = arith.index_cast %7 : i32 to index
    %c0 = arith.constant 0 : index
    %9 = vector.load %arg1[%8, %c0] : memref<64x1xf32, #tpu.memory_space<vmem>>, vector<64x1xf32>
    %10 = vector.broadcast %9 : vector<64x1xf32> to vector<64x50xf32>
    %11 = vector.broadcast %5 : vector<1x50xf32> to vector<64x50xf32>
    %12 = arith.subf %10, %11 : vector<64x50xf32>
    %13 = arith.mulf %12, %12 : vector<64x50xf32>
    %cst_1 = arith.constant -8.000000e+00 : f32
    %14 = vector.broadcast %cst_1 : f32 to vector<64x50xf32>
    %15 = arith.mulf %14, %13 : vector<64x50xf32>
    %16 = math.exp %15 : vector<64x50xf32>
    %17 = arith.index_cast %7 : i32 to index
    %c0_2 = arith.constant 0 : index
    %18 = vector.load %arg2[%17, %c0_2] : memref<64x50xf32, #tpu.memory_space<vmem>>, vector<64x50xf32>
    tpu.vector_store %arg2[%17, %c0_2], %16 {strides = array<i32>} : memref<64x50xf32, #tpu.memory_space<vmem>>, vector<64x50xf32>,
    %c1_i32 = arith.constant 1 : i32
    return
  }
  func.func @transform_0(%arg0: i32) -> (i32, i32) {
    %c0_i32 = arith.constant 0 : i32
    %c0_i32_0 = arith.constant 0 : i32
    return %arg0, %c0_i32 : i32, i32
  }
  func.func @transform_1(%arg0: i32) -> (i32, i32) {
    %c0_i32 = arith.constant 0 : i32
    %c0_i32_0 = arith.constant 0 : i32
    return %arg0, %c0_i32 : i32, i32
  }
}

</mosaic_0001>

<bundles_post_ra>
// kernel: tpu_custom_call.1
= control target key start
LH: loop header
LB: loop body
LE: loop exit
PB: predicated region body
PF: predicated region fallthrough
CT: control target
= control target key end

     0   :  { %v133_v0 = vmov 0   ;;  %v8_v9 = vlaneseq  ;;  %vm101_vm0 = vcmask 408576   ;;  %s200_s0 = inlined_call_operand.vmem [shape: f32[64,1], index: 0, kind: input, shape index: {}]   ;;  %s201_s1 = inlined_call_operand.vmem [shape: f32[64,50], index: 1, kind: output, shape index: {}]  }
   0x1   :  { %116 = vset.pattern.permute.xlu1 %v133_v0  ;;  %115 = vset.pattern.permute.xlu0 %v133_v0  ;;  %v15_v1 = vld [vmem:[%s200_s0 + $0x10] sm:$0xff]  ;;  %v13_v2 = vld [vmem:[%s200_s0] sm:$0xff]  ;;  %v16_v3 = vld [vmem:[%s200_s0 + $0x18] sm:$0xff] }
   0x2   :  { %33 = vperm.xlu1 %116, %v15_v1   ;;  %23 = vperm.xlu0 %115, %v13_v2   ;;  %v14_v4 = vld [vmem:[%s200_s0 + $0x8] sm:$0xff]  ;;  %v17_v6 = vld [vmem:[%s200_s0 + $0x20] sm:$0xff]  ;;  %v20_v7 = vld [vmem:[%s200_s0 + $0x38] sm:$0xff]  ;;  %v9_v10 = vand.u32 127, %v8_v9 }
   0x3   :  { %v18_v5 = vld [vmem:[%s200_s0 + $0x28] sm:$0xff]  ;;  %v19_v8 = vld [vmem:[%s200_s0 + $0x30] sm:$0xff] }
   0x4   :  { %v10_v11 = vcvt.s32.f32 %v9_v10 }
   0x6   :  { %38 = vperm.xlu1 %116, %v16_v3   ;;  %28 = vperm.xlu0 %115, %v14_v4   ;;  %v11_v12 = vmul.f32 0.10204082, %v10_v11 }
   0xa   :  { %48 = vperm.xlu1 %116, %v18_v5   ;;  %43 = vperm.xlu0 %115, %v17_v6  }
   0xe   :  { %58 = vperm.xlu1 %116, %v20_v7   ;;  %53 = vperm.xlu0 %115, %v19_v8  }
  0x7d   :  { %v34_v13 = vpop.permute.xlu1 %33  ;;  %v24_v14 = vpop.permute.xlu0 %23 }
  0x7e   :  { %v63_v15 = vsub.f32 %v34_v13, %v11_v12  ;;  %v61_v16 = vsub.f32 %v24_v14, %v11_v12 }
  0x80   :  { %v71_v17 = vmul.f32 %v63_v15, %v63_v15  ;;  %v69_v18 = vmul.f32 %v61_v16, %v61_v16 }
  0x81   :  { %v39_v19 = vpop.permute.xlu1 %38  ;;  %v29_v20 = vpop.permute.xlu0 %28 }
  0x82   :  { %v79_v21 = vmul.f32 -8.0, %v71_v17  ;;  %v77_v22 = vmul.f32 -8.0, %v69_v18  ;;  %v64_v23 = vsub.f32 %v39_v19, %v11_v12  ;;  %v62_v24 = vsub.f32 %v29_v20, %v11_v12 }
  0x84   :  { %v89_v25 = vmul.f32 1.442695, %v79_v21  ;;  %v85_v26 = vmul.f32 1.442695, %v77_v22  ;;  %v72_v27 = vmul.f32 %v64_v23, %v64_v23  ;;  %v70_v28 = vmul.f32 %v62_v24, %v62_v24 }
  0x85   :  { %v49_v29 = vpop.permute.xlu1 %48  ;;  %v44_v30 = vpop.permute.xlu0 %43 }
  0x86   :  { %117 = vpow2.f32 %v89_v25  ;;  %v80_v31 = vmul.f32 -8.0, %v72_v27  ;;  %v78_v32 = vmul.f32 -8.0, %v70_v28  ;;  %v66_v33 = vsub.f32 %v49_v29, %v11_v12 }
  0x87   :  { %119 = vpow2.f32 %v85_v26  ;;  %v65_v34 = vsub.f32 %v44_v30, %v11_v12 }
  0x88   :  { %v91_v35 = vmul.f32 1.442695, %v80_v31  ;;  %v87_v36 = vmul.f32 1.442695, %v78_v32  ;;  %v74_v37 = vmul.f32 %v66_v33, %v66_v33 }
  0x89   :  { %v73_v38 = vmul.f32 %v65_v34, %v65_v34  ;;  %v59_v39 = vpop.permute.xlu1 %58  ;;  %v54_v40 = vpop.permute.xlu0 %53 }
  0x8a   :  { %121 = vpow2.f32 %v91_v35  ;;  %v82_v41 = vmul.f32 -8.0, %v74_v37  ;;  %v68_v42 = vsub.f32 %v59_v39, %v11_v12  ;;  %v67_v43 = vsub.f32 %v54_v40, %v11_v12 }
  0x8b   :  { %123 = vpow2.f32 %v87_v36  ;;  %v81_v44 = vmul.f32 -8.0, %v73_v38 }
  0x8c   :  { %v95_v45 = vmul.f32 1.442695, %v82_v41  ;;  %v76_v46 = vmul.f32 %v68_v42, %v68_v42  ;;  %v75_v47 = vmul.f32 %v67_v43, %v67_v43 }
  0x8d   :  { %v93_v48 = vmul.f32 1.442695, %v81_v44 }
  0x8e   :  { %125 = vpow2.f32 %v95_v45  ;;  %v84_v49 = vmul.f32 -8.0, %v76_v46  ;;  %v83_v50 = vmul.f32 -8.0, %v75_v47 }
  0x8f   :  { %127 = vpow2.f32 %v93_v48 }
  0x90   :  { %v99_v51 = vmul.f32 1.442695, %v84_v49  ;;  %v97_v52 = vmul.f32 1.442695, %v83_v50 }
  0x92   :  { %129 = vpow2.f32 %v99_v51 }
  0x93   :  { %v118_v53 = vpop.eup %117  ;;  %131 = vpow2.f32 %v97_v52 }
  0x94   :  { %v120_v54 = vpop.eup %119  ;;  %104 = vst.msk [vmem:[%s201_s1 + $0x10] sm:$0xff] %vm101_vm0, %v118_v53 }
  0x95   :  { %102 = vst.msk [vmem:[%s201_s1] sm:$0xff] %vm101_vm0, %v120_v54 }
  0x97   :  { %v122_v55 = vpop.eup %121 }
  0x98   :  { %v124_v56 = vpop.eup %123  ;;  %105 = vst.msk [vmem:[%s201_s1 + $0x18] sm:$0xff] %vm101_vm0, %v122_v55 }
  0x99   :  { %103 = vst.msk [vmem:[%s201_s1 + $0x8] sm:$0xff] %vm101_vm0, %v124_v56 }
  0x9b   :  { %v126_v57 = vpop.eup %125 }
  0x9c   :  { %v128_v58 = vpop.eup %127  ;;  %107 = vst.msk [vmem:[%s201_s1 + $0x28] sm:$0xff] %vm101_vm0, %v126_v57 }
  0x9d   :  { %106 = vst.msk [vmem:[%s201_s1 + $0x20] sm:$0xff] %vm101_vm0, %v128_v58 }
  0x9f   :  { %v130_v59 = vpop.eup %129 }
  0xa0   :  { %v132_v60 = vpop.eup %131  ;;  %109 = vst.msk [vmem:[%s201_s1 + $0x38] sm:$0xff] %vm101_vm0, %v130_v59 }
  0xa1   :  { %108 = vst.msk [vmem:[%s201_s1 + $0x30] sm:$0xff] %vm101_vm0, %v132_v60 }

</bundles_post_ra>
